<compile_context>
chip_gen: v7x
topology: tpu7x:2x2x1
jax: 0.10.0
libtpu: 0.0.40
codegen_flags: <defaults>
</compile_context>

<pallas_src>
import math

import jax
import jax.numpy as jnp
from jax import lax
from jax.experimental import pallas as pl
from jax.experimental.pallas import tpu as pltpu


# -----------------------------------------------------------------------------
# Fast path: table resident in VMEM, gather via one-hot MXU matmul.
# -----------------------------------------------------------------------------
def _make_onehot_kernel(vocab: int, scale: float):
    def kernel(tok_ref, table_ref, out_ref):
        # tok_ref:   (tile, 1) int32 VMEM block of token ids
        # table_ref: (V, E)    VMEM (whole table, resident across grid steps)
        # out_ref:   (tile, E) VMEM output block (lane-dense when E % 128 == 0)
        tile = tok_ref.shape[0]
        ids = jnp.clip(tok_ref[...], 0, vocab - 1)                   # (tile, 1)
        cols = lax.broadcasted_iota(jnp.int32, (tile, vocab), 1)     # (tile, V)
        onehot = jnp.where(ids == cols, 1.0, 0.0).astype(table_ref.dtype)
        # Exactly one nonzero per row -> no accumulation error; result is the
        # selected table row (up to MXU f32 pass rounding).
        emb = jnp.dot(onehot, table_ref[...],
                      preferred_element_type=jnp.float32)            # (tile, E)
        out_ref[...] = (emb * scale).astype(out_ref.dtype)

    return kernel


# -----------------------------------------------------------------------------
# Large-vocab path: table in HBM, deep DMA row-gather straight into the output.
# -----------------------------------------------------------------------------
def _make_gather_kernel(token_tile: int, vocab: int, scale: float, nsem: int):
    def kernel(tok_ref, table_ref, out_ref, sems):
        # tok_ref:   (token_tile,) int32 per-tile block in SMEM
        # table_ref: (V, E) in HBM (memory_space=pl.ANY) -- never VMEM resident
        # out_ref:   (token_tile, E) VMEM output block; rows are DMA'd directly
        #            here (no separate gather buffer -> smaller VMEM footprint)
        # sems:      (nsem,) DMA semaphore ring (up to nsem copies in flight)
        copies = [None] * token_tile

        # Fully unrolled (token_tile is a small static constant) so the LLO
        # scheduler can interleave scalar id reads, descriptor starts and waits
        # across ring slots.
        for r in range(token_tile):
            slot = r % nsem
            # Hoist the scalar id read / clamp above the wait: lets the scalar
            # unit compute the next DMA address while the wait is pending.
            tid = jnp.clip(tok_ref[r], 0, vocab - 1)
            if r >= nsem:
                # Retire the copy that currently owns this semaphore slot,
                # using its exact descriptor (no fragile reconstruction).
                copies[r - nsem].wait()
            c = pltpu.make_async_copy(
                table_ref.at[pl.ds(tid, 1), :],
                out_ref.at[pl.ds(r, 1), :],
                sems.at[slot],
            )
            c.start()
            copies[r] = c

        # Drain the trailing in-flight copies.
        for r in range(max(0, token_tile - nsem), token_tile):
            copies[r].wait()

        # Scale in place (upcast to f32 for the multiply, dtype-generic).
        out_ref[...] = (out_ref[...].astype(jnp.float32) * scale).astype(
            out_ref.dtype
        )

    return kernel


# -----------------------------------------------------------------------------
# Wrapper
# -----------------------------------------------------------------------------
_TILE_OUT_VMEM_BUDGET = 4 * 1024 * 1024  # bytes per (tile, E) output block;
                                         # keeps 2x out blocks + table / SMEM ids
                                         # under the scoped-VMEM default on
                                         # v5e (16 MiB) / v6e (32 MiB) / v7x.


def _choose_token_tile(n_tok: int, requested: int) -> int:
    """Pick a tile that avoids padding (and the post-kernel slice copy) when possible."""
    requested = max(8, (requested // 8) * 8)
    if n_tok <= requested:
        return max(n_tok, 1)          # single tile == full array: always legal
    if n_tok % requested == 0:
        return requested
    # Prefer a multiple-of-8 divisor of n_tok close to the request.
    for t in range(requested, 7, -8):
        if n_tok % t == 0:
            return t
    return requested                  # fall back to padding + final slice


def token_embedding(tokens: jax.Array, emb_table: jax.Array, *,
                    token_tile: int = 128,
                    vmem_table_max_bytes: int = 4 * 1024 * 1024,
                    force_hbm_gather: bool = False) -> jax.Array:
    """Pallas equivalent of TokenEmbedding.forward.

    tokens:    integer array of any shape (e.g. [B, S]).
    emb_table: [V, E] embedding weights (f32 or bf16).
    returns:   tokens.shape + (E,) = emb_table[tokens] * sqrt(E), table dtype.

    token_tile=128 is safe on all generations (<= ~4 MiB per output block for
    E <= 8192 f32); on v6e's 128 MiB VMEM, 256-512 amortizes per-step overhead
    further.  E should ideally be a multiple of 128 for unmasked lane-dense
    output stores (smaller E still works, just with masked writes).
    """
    lead_shape = tokens.shape
    V, E = emb_table.shape
    scale = float(math.sqrt(E))
    n_tok = int(math.prod(lead_shape)) if lead_shape else 1

    flat_tokens = tokens.reshape(n_tok).astype(jnp.int32)

    itemsize = jnp.dtype(emb_table.dtype).itemsize
    # Cap the tile so the (tile, E) output block (double-buffered by the
    # pipeline) stays within budget even for very large E (matters on v7x).
    vmem_cap = max(8, (_TILE_OUT_VMEM_BUDGET // max(E * itemsize, 1)) // 8 * 8)
    tile = _choose_token_tile(n_tok, min(token_tile, vmem_cap))

    n_tiles = pl.cdiv(n_tok, tile)
    n_pad = n_tiles * tile
    if n_pad != n_tok:
        # Pad with id 0 (always in range); padded rows are sliced off below.
        flat_tokens = jnp.pad(flat_tokens, (0, n_pad - n_tok))

    table_bytes = V * E * itemsize
    use_vmem_table = (not force_hbm_gather) and (table_bytes <= vmem_table_max_bytes)

    if use_vmem_table:
        # --- Fast path: small table lives in VMEM, one-hot MXU gather. ---
        out_flat = pl.pallas_call(
            _make_onehot_kernel(V, scale),
            out_shape=jax.ShapeDtypeStruct((n_pad, E), emb_table.dtype),
            grid_spec=pltpu.PrefetchScalarGridSpec(
                num_scalar_prefetch=0,
                grid=(n_tiles,),
                in_specs=[
                    pl.BlockSpec((tile, 1), lambda i: (i, 0)),
                    # Same block every step -> table DMA'd to VMEM only once.
                    pl.BlockSpec((V, E), lambda i: (0, 0)),
                ],
                out_specs=pl.BlockSpec((tile, E), lambda i: (i, 0)),
            ),
            compiler_params=pltpu.CompilerParams(
                dimension_semantics=("parallel",),
            ),
        )(flat_tokens.reshape(n_pad, 1), emb_table)
    else:
        # --- Large-vocab path: table stays in HBM, deep DMA row-gather. ---
        nsem = min(32, tile)  # copies in flight (was 8): hides DMA latency
        out_flat = pl.pallas_call(
            _make_gather_kernel(tile, V, scale, nsem),
            out_shape=jax.ShapeDtypeStruct((n_pad, E), emb_table.dtype),
            grid_spec=pltpu.PrefetchScalarGridSpec(
                num_scalar_prefetch=0,
                grid=(n_tiles,),
                in_specs=[
                    # Tiny per-tile SMEM block of ids: pipelines with the grid
                    # and scales to arbitrary B*S (no whole-array SMEM prefetch).
                    pl.BlockSpec((tile,), lambda i: (i,),
                                 memory_space=pltpu.MemorySpace.SMEM),
                    # Embedding table: raw HBM ref, rows gathered via DMA.
                    pl.BlockSpec(memory_space=pl.ANY),
                ],
                out_specs=pl.BlockSpec((tile, E), lambda i: (i, 0)),
                scratch_shapes=[pltpu.SemaphoreType.DMA((nsem,))],
            ),
            compiler_params=pltpu.CompilerParams(
                dimension_semantics=("parallel",),
            ),
        )(flat_tokens, emb_table)

    if n_pad != n_tok:
        out_flat = out_flat[:n_tok]
    return out_flat.reshape(lead_shape + (E,))


if __name__ == "__main__":
    # Small, module-consistent shapes.
    VOCAB_SIZE = 64
    EMB_SIZE = 128
    BATCH = 2
    SEQ = 8

    key = jax.random.PRNGKey(0)
    k_emb, k_tok = jax.random.split(key)

    # Deterministic "parameter" init (stand-in for nn.Embedding weights).
    emb_table = jax.random.normal(k_emb, (VOCAB_SIZE, EMB_SIZE), dtype=jnp.float32)
    tokens = jax.random.randint(k_tok, (BATCH, SEQ), 0, VOCAB_SIZE, dtype=jnp.int32)

    # Pure-JAX reference: embedding gather * sqrt(emb_size).
    ref = emb_table[tokens] * math.sqrt(EMB_SIZE)

    # Fast path (table fits VMEM): one-hot MXU gather.
    out_fast = jax.block_until_ready(token_embedding(tokens, emb_table))
    assert out_fast.shape == (BATCH, SEQ, EMB_SIZE)
    assert out_fast.dtype == jnp.float32
    # Tolerance allows for reduced-precision MXU f32 passes; real indexing bugs
    # would be O(1)-O(10) errors and still caught.
    assert jnp.allclose(out_fast, ref, atol=1e-2, rtol=1e-2), "fast path mismatch"

    # Large-vocab path (forced): HBM table + DMA row-gather ring. Exact copy.
    out_gather = jax.block_until_ready(
        token_embedding(tokens, emb_table, force_hbm_gather=True))
    assert out_gather.shape == (BATCH, SEQ, EMB_SIZE)
    assert jnp.allclose(out_gather, ref, atol=1e-5, rtol=1e-5), "gather path mismatch"

    print("KERNEL_OK")
</pallas_src>

<mosaic_0001>
module attributes {stable_mosaic.version = 11 : i64} {
  func.func @kernel(%arg0: i32, %arg1: memref<16x1xi32, #tpu.memory_space<vmem>>, %arg2: memref<64x128xf32, #tpu.memory_space<vmem>>, %arg3: memref<16x128xf32, #tpu.memory_space<vmem>>) attributes {dimension_semantics = [#tpu.dimension_semantics<parallel>], iteration_bounds = array<i64: 1>, scalar_prefetch = 0 : i64, scratch_operands = 0 : i64, tpu.core_type = #tpu.core_type<tc>, window_params = [{transform_indices = @transform_0, window_bounds = array<i64: 16, 1>}, {pipeline_mode = #tpu.pipeline_mode<synchronous>, transform_indices = @transform_1, window_bounds = array<i64: 64, 128>}, {transform_indices = @transform_2, window_bounds = array<i64: 16, 128>}]} {
    %c0 = arith.constant 0 : index
    %c0_0 = arith.constant 0 : index
    %0 = vector.load %arg1[%c0, %c0_0] : memref<16x1xi32, #tpu.memory_space<vmem>>, vector<16x1xi32>
    %c0_i32 = arith.constant 0 : i32
    %c63_i32 = arith.constant 63 : i32
    %1 = vector.broadcast %c0_i32 : i32 to vector<16x1xi32>
    %2 = arith.maxsi %1, %0 : vector<16x1xi32>
    %3 = vector.broadcast %c63_i32 : i32 to vector<16x1xi32>
    %4 = arith.minsi %3, %2 : vector<16x1xi32>
    %5 = tpu.iota {dimensions = array<i32: 1>} : vector<16x64xi32>
    %6 = vector.broadcast %4 : vector<16x1xi32> to vector<16x64xi32>
    %7 = arith.cmpi eq, %6, %5 : vector<16x64xi32>
    %cst = arith.constant 1.000000e+00 : f32
    %cst_1 = arith.constant 0.000000e+00 : f32
    %8 = vector.broadcast %cst : f32 to vector<16x64xf32>
    %9 = vector.broadcast %cst_1 : f32 to vector<16x64xf32>
    %10 = arith.select %7, %8, %9 : vector<16x64xi1>, vector<16x64xf32>
    %c0_2 = arith.constant 0 : index
    %c0_3 = arith.constant 0 : index
    %11 = vector.load %arg2[%c0_2, %c0_3] : memref<64x128xf32, #tpu.memory_space<vmem>>, vector<64x128xf32>
    %cst_4 = arith.constant dense<0.000000e+00> : vector<16x128xf32>
    %12 = tpu.matmul %10, %11, %cst_4 {dimension_numbers = #tpu.dot_dimension_numbers<[1], [0], [0], [1], [0, 0, 1, 1], [], []>} : vector<16x64xf32>, vector<64x128xf32>, vector<16x128xf32> -> vector<16x128xf32>
    %cst_5 = arith.constant 11.3137083 : f32
    %13 = vector.broadcast %cst_5 : f32 to vector<16x128xf32>
    %14 = arith.mulf %12, %13 : vector<16x128xf32>
    %c0_6 = arith.constant 0 : index
    %c0_7 = arith.constant 0 : index
    %15 = vector.load %arg3[%c0_6, %c0_7] : memref<16x128xf32, #tpu.memory_space<vmem>>, vector<16x128xf32>
    tpu.vector_store %arg3[%c0_6, %c0_7], %14 {strides = array<i32>} : memref<16x128xf32, #tpu.memory_space<vmem>>, vector<16x128xf32>,
    return
  }
  func.func @transform_0(%arg0: i32) -> (i32, i32) {
    %c0_i32 = arith.constant 0 : i32
    %c0_i32_0 = arith.constant 0 : i32
    return %arg0, %c0_i32 : i32, i32
  }
  func.func @transform_1(%arg0: i32) -> (i32, i32) {
    %c0_i32 = arith.constant 0 : i32
    %c0_i32_0 = arith.constant 0 : i32
    %c0_i32_1 = arith.constant 0 : i32
    return %c0_i32, %c0_i32_0 : i32, i32
  }
  func.func @transform_2(%arg0: i32) -> (i32, i32) {
    %c0_i32 = arith.constant 0 : i32
    %c0_i32_0 = arith.constant 0 : i32
    return %arg0, %c0_i32 : i32, i32
  }
}

</mosaic_0001>

<bundles_post_ra>
// kernel: tpu_custom_call.1
= control target key start
LH: loop header
LB: loop body
LE: loop exit
PB: predicated region body
PF: predicated region fallthrough
CT: control target
= control target key end

     0   :  { %7 = vsyncpa [#allocation3], 0  ;;  %s318_s0 = inlined_call_operand.vmem [shape: s32[16,1], index: 0, kind: input, shape index: {}]   ;;  %s319_s1 = inlined_call_operand.hbm [shape: f32[64,128], index: 1, kind: input, shape index: {}]   ;;  %s320_s2 = inlined_call_operand.hbm [shape: f32[16,128], index: 2, kind: output, shape index: {}]  }
   0x1   :  { %8 = vsyncpa [#allocation4], 0  ;;  %s261_s9 = smov [#allocation2]   ;;  %s213_s13 = scalar_lea.hbm %s319_s1, 1024 }
   0x2   :  { %s16_s10 = sshll.u32 %s261_s9, 4  ;;  %p214_p0 = scmp.ne.s32.totalorder %s319_s1, %s213_s13  ;;  %s17_s10 = int_to_ptr.vmem [resolvable:$true] %s16_s10 }
   0x3   :  { %p217_p1 = scmp.lt.u32.totalorder %s213_s13, %s319_s1 }
   0x5   :  { %p219_p2 = pnand %p217_p1, %p214_p0 }
   0x7   :  { %222 = shalt.err (!%p219_p2)
}
   0x8   :  { %s223_s18 = scalar_lea.vmem %s17_s10, 1024  ;;  %p228_p4 = scmp.lt.s32.totalorder %s17_s10, %s17_s10 }
   0x9   :  { %p224_p3 = scmp.ne.s32.totalorder %s17_s10, %s223_s18  ;;  %p229_p5 = scmp.lt.s32.totalorder %s223_s18, %s223_s18 }
   0xb   :  { %p230_p6 = por %p229_p5, %p228_p4 }
   0xd   :  { %p231_p7 = pnand %p230_p6, %p224_p3 }
   0xf   :  { %234 = shalt.err (!%p231_p7)
}
  0x10   :  { %s262_s19 = smov 128   ;;  %s263_s20 = smov 8  }
  0x11   :  { %22 = dma.hbm_to_vmem [thread:$0]  %s319_s1, 1024, %s17_s10, [#allocation3], %s262_s19, %s262_s19, %s263_s20  }
  0x12   :  { %257 = dma.done.wait [#allocation3], 1024  }
  0x13   :  { %258 = vsyncadd [#allocation3], 4294966272  ;;  %v264_v0 = vmov 0   ;;  %v26_v1 = vld [vmem:[%s318_s0] sm:$0xff]  ;;  %v27_v2 = vld [vmem:[%s318_s0 + $0x8] sm:$0xff]  ;;  %v36_v19 = vlaneseq  ;;  %vm56_vm4 = vcmask 523264  }
  0x14   :  { %212 = vset.pattern.permute.xlu0 %v264_v0  ;;  %v48_v3 = vld [vmem:[#allocation2] sm:$0xff]  ;;  %vm28_vm0 = vcmp.gt.s32.totalorder %v26_v1, 0  ;;  %vm30_vm1 = vcmp.gt.s32.totalorder %v27_v2, 0  ;;  %v49_v4 = vld [vmem:[#allocation2 + $0x8] sm:$0xff]  ;;  %v50_v5 = vld [vmem:[#allocation2 + $0x10] sm:$0xff]  ;;  %v265_v22 = vmov 0.0  }
  0x15   :  { %v51_v6 = vld [vmem:[#allocation2 + $0x18] sm:$0xff]  ;;  %v29_v7 = vsel %vm28_vm0, %v26_v1, 0  ;;  %v31_v8 = vsel %vm30_vm1, %v27_v2, 0  ;;  %v190_v9 = vpack.c.bf16 %v49_v4, %v48_v3  ;;  %v52_v11 = vld [vmem:[#allocation2 + $0x20] sm:$0xff]  ;;  %v53_v12 = vld [vmem:[#allocation2 + $0x28] sm:$0xff]  ;;  %v37_v20 = vand.u32 127, %v36_v19 }
  0x16   :  { %v194_v10 = vpack.c.bf16 %v51_v6, %v50_v5  ;;  %vm32_vm2 = vcmp.lt.s32.totalorder %v29_v7, 63  ;;  %vm34_vm3 = vcmp.lt.s32.totalorder %v31_v8, 63  ;;  %v198_v15 = vpack.c.bf16 %v53_v12, %v52_v11  ;;  %v54_v16 = vld [vmem:[#allocation2 + $0x30] sm:$0xff]  ;;  %v55_v17 = vld [vmem:[#allocation2 + $0x38] sm:$0xff]  ;;  %s266_s0 = smov [#allocation5]  }
  0x17   :  { %v33_v13 = vsel %vm32_vm2, %v29_v7, 63  ;;  %191 = vmatprep.subr.bf16.mxu0 %v190_v9  ;;  %v35_v14 = vsel %vm34_vm3, %v31_v8, 63  ;;  %v202_v18 = vpack.c.bf16 %v55_v17, %v54_v16  ;;  %s147_s1 = sshll.u32 %s266_s0, 4  ;;  %s148_s1 = int_to_ptr.vmem [resolvable:$true] %s147_s1 }
  0x18   :  { %39 = vperm.xlu0 %212, %v33_v13   ;;  %193 = vmatpush3.bf16.msra.mxu0 %v190_v9  ;;  %s235_s27 = scalar_lea.vmem %s148_s1, 256  ;;  %p240_p9 = scmp.lt.s32.totalorder %s148_s1, %s148_s1 }
  0x19   :  { %195 = vmatprep.subr.bf16.mxu0 %v194_v10  ;;  %p236_p8 = scmp.ne.s32.totalorder %s148_s1, %s235_s27  ;;  %p241_p10 = scmp.lt.s32.totalorder %s235_s27, %s235_s27 }
  0x1b   :  { %p242_p11 = por %p241_p10, %p240_p9 }
  0x1c   :  { %42 = vperm.xlu0 %212, %v35_v14   ;;  %197 = vmatpush3.bf16.msra.mxu0 %v194_v10 }
  0x1d   :  { %199 = vmatprep.subr.bf16.mxu0 %v198_v15  ;;  %p243_p12 = pnand %p242_p11, %p236_p8 }
  0x20   :  { %201 = vmatpush3.bf16.msra.mxu0 %v198_v15 }
  0x21   :  { %203 = vmatprep.subr.bf16.mxu0 %v202_v18 }
  0x24   :  { %205 = vmatpush3.bf16.msra.mxu0 %v202_v18 }
  0x97   :  { %v40_v21 = vpop.permute.xlu0 %39 }
  0x98   :  { %vm44_vm5 = vcmp.eq.s32.totalorder %v40_v21, %v37_v20 }
  0x99   :  { %v46_v23 = vsel %vm44_vm5, 1.0, %v265_v22 }
  0x9a   :  { %187 = vmatprep.mubr.msk.f32.mxu0 %vm56_vm4, %v46_v23 }
  0x9b   :  { %v43_v24 = vpop.permute.xlu0 %42 }
  0x9c   :  { %vm45_vm6 = vcmp.eq.s32.totalorder %v43_v24, %v37_v20 }
  0x9d   :  { %v47_v25 = vsel %vm45_vm6, 1.0, %v265_v22 }
  0x9e   :  { %188 = vmatmul.mubr.msk.f32.vlgmr.msra.gmra.mrb[0].mxu0 %vm56_vm4, %v47_v25 }
 0x171   :  { %v189_v26 = vpop.f32.mrb[0].mxu0 }
 0x172   :  { %v139_v27 = vmul.f32 11.313708, %v189_v26  ;;  %v129_v28 = vpop.f32.mrb[1].mxu0 }
 0x173   :  { %v138_v29 = vmul.f32 11.313708, %v129_v28 }
 0x174   :  { %141 = vst [vmem:[#allocation5 + $0x8] sm:$0xff] %v139_v27 }
 0x175   :  { %140 = vst [vmem:[#allocation5] sm:$0xff] %v138_v29 }
 0x176   :  { %246 = shalt.err (!%p243_p12)
}
 0x177   :  { %s247_s30 = scalar_lea.hbm %s320_s2, 256 }
 0x178   :  { %p248_p13 = scmp.ne.s32.totalorder %s320_s2, %s247_s30  ;;  %p251_p0 = scmp.lt.u32.totalorder %s247_s30, %s320_s2 }
 0x17a   :  { %p253_p1 = pnand %p251_p0, %p248_p13 }
 0x17c   :  { %256 = shalt.err (!%p253_p1)
}
 0x17d   :  { %153 = dma.vmem_to_hbm [thread:$0]  %s148_s1, 256, %s320_s2, [#allocation4], %s262_s19, %s262_s19, %s263_s20  }
 0x17e   :  { %259 = dma.done.wait [#allocation4], 256  }
 0x17f   :  { %260 = vsyncadd [#allocation4], 4294967040 }
 0x180   :  { %157 = vsyncpa [#allocation3], 1 }
 0x181   :  { %158 = vsyncpa [#allocation4], 1 }

</bundles_post_ra>
